<compile_context>
chip_gen: v7x
topology: tpu7x:2x2x1
jax: 0.10.0
libtpu: 0.0.40
codegen_flags: <defaults>
</compile_context>

<pallas_src>
import functools
import math

import jax
import jax.numpy as jnp
import numpy as np
from jax.experimental import pallas as pl
from jax.experimental.pallas import tpu as pltpu


# ----------------------------------------------------------------------------
# Kernel
# ----------------------------------------------------------------------------
def _svd_head_kernel(se_ref, te_ref, sc_ref, ta_ref, corr_ref, h_ref, *,
                     inv_sqrt_dk, mxu_dtype, approx_recip):
    """One (batch-block b, query-tile q) grid step.

    se_ref  : (Bt, TQ, d_k)  src embedding (pre-transposed) -> natural [M, K]
    te_ref  : (Bt, d_k, N)   full tgt embedding             -> natural [K, N]
    sc_ref  : (Bt, 3, TQ)    pre-centered src points (f32)
    ta_ref  : (Bt, N, 4)     tgt points (transposed) + ones column (f32)
    corr_ref: (Bt, 3, TQ)    src_corr output tile (lane dense)
    h_ref   : (Bt, 3, 3)     per-(batch, query-tile) cross-covariance partial
    """
    se = se_ref[...]
    te = te_ref[...]
    sc = sc_ref[...]
    ta = ta_ref[...]

    # Fold 1/sqrt(d_k) into the small (TQ, d_k) operand; scale in f32 (v5e has no
    # bf16 VALU) and cast only the MXU operands to the bf16 compute dtype.
    lhs = se.astype(jnp.float32) * inv_sqrt_dk
    if mxu_dtype is not None:
        lhs = lhs.astype(mxu_dtype)
        rhs = te.astype(mxu_dtype)
    else:
        rhs = te.astype(jnp.float32)

    # logits[b, i, j] = <src_emb[b, :, i], tgt_emb[b, :, j]> / sqrt(d_k)
    # Both operands are already in natural MXU layout -> no hidden XLU relayout.
    logits = jnp.einsum("bqd,bdn->bqn", lhs, rhs,
                        preferred_element_type=jnp.float32)        # (Bt, TQ, N) f32

    # Row-stabilized exp.  max/sub/exp math stays f32 (EUP); on the bf16 path the
    # (TQ, N) tile fed back to the MXU is bf16, halving its VMEM / vld / vst bytes.
    m = jnp.max(logits, axis=-1, keepdims=True)
    e = jnp.exp(logits - m)
    if mxu_dtype is not None:
        e_op = e.astype(mxu_dtype)
        ta_op = ta.astype(mxu_dtype)
    else:
        e_op = e
        ta_op = ta

    # One MXU call yields both the unnormalized correspondences and the softmax
    # row-sums (from the appended ones column):
    #   prod[b, i, :3] = sum_j e[b,i,j] * tgt[b,:,j]    prod[b, i, 3] = sum_j e[b,i,j]
    # Orientation (TQ, N) x (N, 4): the big exp tile streams through the MXU
    # untransposed; only the tiny (TQ, 3) result is transposed afterwards.
    prod = jnp.einsum("bqn,bnc->bqc", e_op, ta_op,
                      preferred_element_type=jnp.float32)          # (Bt, TQ, 4)

    denom = prod[..., 3:4]                                          # (Bt, TQ, 1)
    # N reciprocals + 3N multiplies instead of N^2 divides.
    corr_t = prod[..., :3] * pl.reciprocal(denom, approx=approx_recip)   # (Bt, TQ, 3)

    # Per-tile cross-covariance partial H_q = sum_i src_centered_i @ corr_i^T.
    # (Queries padded past N have src_centered == 0, so they contribute nothing;
    #  the corr_mean term vanishes because sum_i(src_i - src_mean) == 0.)
    h_ref[...] = jnp.einsum("bdq,bqe->bde", sc, corr_t,
                            preferred_element_type=jnp.float32)     # (Bt, 3, 3)

    # Small (TQ, 3) -> (3, TQ) transposes (one 2-D XLU transpose per sub-batch)
    # so the src_corr store stays lane dense.
    for b in range(corr_ref.shape[0]):           # static unroll over the batch block
        corr_ref[b] = corr_t[b].T.astype(corr_ref.dtype)


# ----------------------------------------------------------------------------
# Tiling / VMEM planning (shared footprint estimate for tile pick + vmem limit)
# ----------------------------------------------------------------------------
def _round_up(x, m):
    return (x + m - 1) // m * m


def _tile_bytes(rows, cols, itemsize):
    sublane = {1: 32, 2: 16}.get(itemsize, 8)
    return _round_up(max(rows, 1), sublane) * _round_up(max(cols, 1), 128) * itemsize


def _vmem_capacity():
    try:
        return int(getattr(pltpu.get_tpu_info(), "vmem_capacity_bytes", 64 << 20))
    except Exception:
        return 64 << 20  # conservative fallback: v7x per-TensorCore physical VMEM


def _plan(B, d_k, N, emb_itemsize, out_itemsize, mxu_itemsize, query_tile, batch_tile):
    """Returns (Bt, tq, Nq_padded, single_buffer_full_inputs, vmem_limit_bytes)."""
    cap = _vmem_capacity()
    budget = int(cap * 0.65)        # generation aware: ~83 MiB on v5e/v6e, ~41 MiB on v7x

    def full_input_bytes(bt):
        return bt * (_tile_bytes(d_k, N, emb_itemsize) + _tile_bytes(N, 4, 4))

    def single_buf(bt, tq, nq_pad):
        # Double-buffering the per-batch-invariant full-N inputs buys nothing when
        # the query axis is tiled; drop to one buffer once they are big enough to matter.
        return (nq_pad // tq) > 1 and full_input_bytes(bt) > (2 << 20)

    def footprint(bt, tq, nq_pad):
        full_bufs = 1 if single_buf(bt, tq, nq_pad) else 2
        f = 0
        # pipeline buffers (inputs + outputs)
        f += 2 * bt * _tile_bytes(tq, d_k, emb_itemsize)          # src embedding tile
        f += full_bufs * bt * _tile_bytes(d_k, N, emb_itemsize)   # tgt embedding (full)
        f += 2 * bt * _tile_bytes(3, tq, 4)                       # centered src tile
        f += full_bufs * bt * _tile_bytes(N, 4, 4)                # tgt points + ones (full)
        f += 2 * bt * _tile_bytes(3, tq, out_itemsize)            # src_corr tile (out)
        f += 2 * bt * _tile_bytes(3, 3, 4)                        # H partial (out)
        # in-kernel intermediates
        f += bt * _tile_bytes(tq, N, 4)                           # logits (f32)
        f += bt * _tile_bytes(tq, N, mxu_itemsize)                # exp tile
        f += bt * (2 * _tile_bytes(tq, 4, 4) + _tile_bytes(3, tq, 4)
                   + _tile_bytes(tq, 1, 4))                       # prod / corr / rowmax
        return f

    # --- query-axis tiling ---------------------------------------------------
    if query_tile is not None:
        tq = int(query_tile)
        if tq < N:
            assert tq % 128 == 0, "query_tile must be a multiple of 128 (or >= N)"
            nq_pad = _round_up(N, tq)
        else:
            tq, nq_pad = N, N
    elif N <= 128 or footprint(1, N, N) <= budget:
        tq, nq_pad = N, N
    else:
        cands = [t for t in (1024, 512, 256, 128) if t < N]
        tq = None
        for t in cands:                       # prefer exact divisors (no padding)
            if N % t == 0 and footprint(1, t, N) <= budget:
                tq, nq_pad = t, N
                break
        if tq is None:
            for t in cands:                   # otherwise pad the query axis
                npad = _round_up(N, t)
                if footprint(1, t, npad) <= budget:
                    tq, nq_pad = t, npad
                    break
        if tq is None:
            # TODO(synk): key-axis (N) tiling with online softmax for very large N.
            tq, nq_pad = 128, _round_up(N, 128)

    # --- batch tiling (only when the whole query axis fits in one tile) -------
    bt = 1
    if batch_tile is not None:
        bt = int(batch_tile)
        assert B % bt == 0
    elif tq == nq_pad and B > 1:
        for cand in (16, 8, 4, 2):
            if B % cand == 0 and footprint(cand, tq, nq_pad) <= budget:
                bt = cand
                break

    est = footprint(bt, tq, nq_pad)
    vmem_limit = int(min(max(int(est * 1.3) + (8 << 20), 32 << 20), cap))
    return bt, tq, nq_pad, single_buf(bt, tq, nq_pad), vmem_limit


# ----------------------------------------------------------------------------
# Forward wrapper (matches SVDHead.forward semantics)
# ----------------------------------------------------------------------------
def svd_head_forward(src_embedding, tgt_embedding, src, tgt, use_mFea=False, *,
                     mxu_dtype=None, approx_softmax_recip=False,
                     query_tile=None, batch_tile=None):
    """Returns (R, t, src, src_corr) matching SVDHead.forward.

    mxu_dtype: cast the MXU operands (embeddings, exp tile, tgt/ones operand) to
        this dtype (e.g. jnp.bfloat16) with f32 accumulation.  bf16 inputs take
        the bf16 MXU path automatically.
    approx_softmax_recip: use the EUP approximate reciprocal for the softmax
        denominator (exact by default).
    """
    if use_mFea:
        # torch: transpose -> split([3, 5], dim=2)[0] -> transpose == first 3 channels
        src = src[:, :3, :]
        tgt = tgt[:, :3, :]

    B, d_k, N = src_embedding.shape
    assert tgt_embedding.shape == (B, d_k, N)
    assert src.shape == (B, 3, N) and tgt.shape == (B, 3, N)

    # Resolve the MXU compute dtype: bf16 inputs -> bf16-native MXU path.
    if mxu_dtype is None and src_embedding.dtype == jnp.bfloat16:
        mxu_dtype = jnp.bfloat16
    emb_dtype = jnp.dtype(mxu_dtype) if mxu_dtype is not None else jnp.dtype(src_embedding.dtype)
    emb_itemsize = emb_dtype.itemsize
    mxu_itemsize = emb_itemsize if mxu_dtype is not None else 4

    out_dtype = tgt.dtype
    out_itemsize = jnp.dtype(out_dtype).itemsize

    Bt, tq, Nq, single_buf_full, vmem_limit = _plan(
        B, d_k, N, emb_itemsize, out_itemsize, mxu_itemsize, query_tile, batch_tile)
    nq = Nq // tq
    grid = (B // Bt, nq)

    # Wrapper-side layout plumbing (one-time XLA transposes / casts) so every
    # in-kernel contraction is in natural MXU orientation.
    src_f32 = src.astype(jnp.float32)
    src_mean = jnp.mean(src_f32, axis=2, keepdims=True)                    # (B, 3, 1)
    src_centered = src_f32 - src_mean                                      # (B, 3, N)
    se_t = jnp.swapaxes(src_embedding, 1, 2).astype(emb_dtype)             # (B, N, d_k)
    tgt_emb_in = tgt_embedding.astype(emb_dtype)                           # (B, d_k, N)
    tgt_aug_t = jnp.concatenate(
        [jnp.swapaxes(tgt, 1, 2).astype(jnp.float32),
         jnp.ones((B, N, 1), jnp.float32)], axis=-1)                       # (B, N, 4)

    if Nq != N:
        pad = Nq - N
        se_t = jnp.pad(se_t, ((0, 0), (0, pad), (0, 0)))
        src_centered = jnp.pad(src_centered, ((0, 0), (0, 0), (0, pad)))

    kernel = functools.partial(
        _svd_head_kernel,
        inv_sqrt_dk=1.0 / math.sqrt(d_k),
        mxu_dtype=mxu_dtype,
        approx_recip=approx_softmax_recip)

    # Single-buffer the per-batch-invariant full-N inputs when the query axis is
    # tiled (their block index only changes once per batch) and they are large.
    full_mode = dict(pipeline_mode=pl.Buffered(1)) if single_buf_full else {}

    src_corr_pad, h_parts = pl.pallas_call(
        kernel,
        out_shape=(
            jax.ShapeDtypeStruct((B, 3, Nq), out_dtype),        # src_corr (padded queries)
            jax.ShapeDtypeStruct((B, nq, 3, 3), jnp.float32),   # per-tile H partials
        ),
        grid_spec=pltpu.PrefetchScalarGridSpec(
            num_scalar_prefetch=0,
            grid=grid,
            in_specs=[
                pl.BlockSpec((Bt, tq, d_k), lambda b, q: (b, q, 0)),            # src emb tile
                pl.BlockSpec((Bt, d_k, N), lambda b, q: (b, 0, 0), **full_mode),  # tgt emb
                pl.BlockSpec((Bt, 3, tq), lambda b, q: (b, 0, q)),              # centered src
                pl.BlockSpec((Bt, N, 4), lambda b, q: (b, 0, 0), **full_mode),  # tgt pts+ones
            ],
            out_specs=[
                pl.BlockSpec((Bt, 3, tq), lambda b, q: (b, 0, q)),              # src_corr tile
                pl.BlockSpec((Bt, None, 3, 3), lambda b, q: (b, q, 0, 0)),      # H partial
            ],
        ),
        compiler_params=pltpu.CompilerParams(
            # Every grid step is independent (per-tile H partials) -> both axes
            # parallel: batch AND query tiles can shard across v7x's two TensorCores.
            dimension_semantics=("parallel", "parallel"),
            vmem_limit_bytes=vmem_limit,
        ),
    )(se_t, tgt_emb_in, src_centered, tgt_aug_t)

    src_corr = src_corr_pad[:, :, :N]
    H = jnp.sum(h_parts, axis=1)                                           # (B, 3, 3)

    # TODO(synk): per-batch 3x3 SVD / det / reflection fix have no clean Pallas
    # TPU equivalent; they are tiny (B x 3 x 3) plain-JAX wrapper glue.
    corr_mean = jnp.mean(src_corr.astype(jnp.float32), axis=2, keepdims=True)  # (B, 3, 1)

    U, _, Vh = jnp.linalg.svd(H)
    V = jnp.swapaxes(Vh, -1, -2)                 # torch.svd returns V, jax returns V^H
    Ut = jnp.swapaxes(U, -1, -2)
    R0 = jnp.matmul(V, Ut)
    det = jnp.linalg.det(R0)
    # self.reflect = eye(3) with [2, 2] = -1 (deterministic, non-trainable)
    reflect = jnp.diag(jnp.array([1.0, 1.0, -1.0], dtype=jnp.float32))
    V = jnp.where(det[:, None, None] < 0, jnp.matmul(V, reflect), V)
    R = jnp.matmul(V, Ut)

    t = jnp.matmul(-R, src_mean) + corr_mean     # (B, 3, 1)
    return R, t.reshape(B, 3), src, src_corr


# ----------------------------------------------------------------------------
# Plain-JAX reference of the torch forward (for the smoke-test checks)
# ----------------------------------------------------------------------------
def _reference_forward(src_embedding, tgt_embedding, src, tgt):
    d_k = src_embedding.shape[1]
    scores = jnp.einsum("bdn,bdm->bnm", src_embedding, tgt_embedding) / math.sqrt(d_k)
    scores = jax.nn.softmax(scores, axis=2)
    src_corr = jnp.einsum("bdm,bnm->bdn", tgt, scores)
    src_mean = src.mean(axis=2, keepdims=True)
    corr_mean = src_corr.mean(axis=2, keepdims=True)
    H = jnp.einsum("bdn,ben->bde", src - src_mean, src_corr - corr_mean)
    U, _, Vh = jnp.linalg.svd(H)
    V = jnp.swapaxes(Vh, -1, -2)
    Ut = jnp.swapaxes(U, -1, -2)
    R0 = jnp.matmul(V, Ut)
    det = jnp.linalg.det(R0)
    reflect = jnp.diag(jnp.array([1.0, 1.0, -1.0], dtype=jnp.float32))
    V = jnp.where(det[:, None, None] < 0, jnp.matmul(V, reflect), V)
    R = jnp.matmul(V, Ut)
    t = jnp.matmul(-R, src_mean) + corr_mean
    return R, t.reshape(-1, 3), src, src_corr


if __name__ == "__main__":
    key = jax.random.PRNGKey(0)
    k1, k2, k3, k4, k5, k6, k7, k8 = jax.random.split(key, 8)

    # ---- Test 1: small shapes, f32 path (exercises the batch-tiled grid step) ----
    B, emb_dims, N = 2, 32, 16
    src_embedding = jax.random.normal(k1, (B, emb_dims, N), dtype=jnp.float32)
    tgt_embedding = jax.random.normal(k2, (B, emb_dims, N), dtype=jnp.float32)
    src = jax.random.normal(k3, (B, 3, N), dtype=jnp.float32)
    tgt = jax.random.normal(k4, (B, 3, N), dtype=jnp.float32)

    R, t, src_out, src_corr = svd_head_forward(
        src_embedding, tgt_embedding, src, tgt, use_mFea=False)
    jax.block_until_ready((R, t, src_out, src_corr))

    assert R.shape == (B, 3, 3)
    assert t.shape == (B, 3)
    assert src_out.shape == (B, 3, N)
    assert src_corr.shape == (B, 3, N)

    R_ref, t_ref, _, corr_ref = _reference_forward(src_embedding, tgt_embedding, src, tgt)
    np.testing.assert_allclose(np.asarray(src_corr), np.asarray(corr_ref),
                               rtol=1e-3, atol=1e-3)
    np.testing.assert_allclose(np.asarray(R), np.asarray(R_ref), rtol=1e-3, atol=1e-3)
    np.testing.assert_allclose(np.asarray(t), np.asarray(t_ref), rtol=1e-3, atol=1e-3)

    # ---- Test 2: tiled + padded query axis (N=200 -> 256, tq=128), f32 path ------
    B2, d2, N2 = 2, 64, 200
    se2 = jax.random.normal(k5, (B2, d2, N2), dtype=jnp.float32)
    te2 = jax.random.normal(k6, (B2, d2, N2), dtype=jnp.float32)
    s2 = jax.random.normal(k7, (B2, 3, N2), dtype=jnp.float32)
    t2in = jax.random.normal(k8, (B2, 3, N2), dtype=jnp.float32)

    R2, t2, _, corr2 = svd_head_forward(se2, te2, s2, t2in, query_tile=128)
    jax.block_until_ready((R2, t2, corr2))

    R2_ref, t2_ref, _, corr2_ref = _reference_forward(se2, te2, s2, t2in)
    np.testing.assert_allclose(np.asarray(corr2), np.asarray(corr2_ref),
                               rtol=1e-3, atol=1e-3)
    np.testing.assert_allclose(np.asarray(R2), np.asarray(R2_ref), rtol=2e-3, atol=2e-3)
    np.testing.assert_allclose(np.asarray(t2), np.asarray(t2_ref), rtol=2e-3, atol=2e-3)

    # ---- Test 3: bf16 MXU path (explicitly bounded looser tolerance) -------------
    Rb, tb, _, cb = svd_head_forward(src_embedding, tgt_embedding, src, tgt,
                                     mxu_dtype=jnp.bfloat16,
                                     approx_softmax_recip=True)
    jax.block_until_ready((Rb, tb, cb))
    np.testing.assert_allclose(np.asarray(cb), np.asarray(corr_ref),
                               rtol=5e-2, atol=5e-2)
    Rb_np = np.asarray(Rb)
    rtr = np.matmul(Rb_np, np.swapaxes(Rb_np, -1, -2))
    np.testing.assert_allclose(rtr, np.broadcast_to(np.eye(3, dtype=np.float32), rtr.shape),
                               atol=1e-2)
    assert np.all(np.linalg.det(Rb_np) > 0)

    print("KERNEL_OK")
</pallas_src>

<mosaic_0001>
module attributes {stable_mosaic.version = 11 : i64} {
  func.func @_svd_head_kernel(%arg0: i32, %arg1: i32, %arg2: memref<2x16x32xf32, #tpu.memory_space<vmem>>, %arg3: memref<2x32x16xf32, #tpu.memory_space<vmem>>, %arg4: memref<2x3x16xf32, #tpu.memory_space<vmem>>, %arg5: memref<2x16x4xf32, #tpu.memory_space<vmem>>, %arg6: memref<2x3x16xf32, #tpu.memory_space<vmem>>, %arg7: memref<2x1x3x3xf32, #tpu.memory_space<vmem>>) attributes {dimension_semantics = [#tpu.dimension_semantics<parallel>, #tpu.dimension_semantics<parallel>], iteration_bounds = array<i64: 1, 1>, scalar_prefetch = 0 : i64, scratch_operands = 0 : i64, tpu.core_type = #tpu.core_type<tc>, window_params = [{transform_indices = @transform_0, window_bounds = array<i64: 2, 16, 32>}, {transform_indices = @transform_1, window_bounds = array<i64: 2, 32, 16>}, {transform_indices = @transform_2, window_bounds = array<i64: 2, 3, 16>}, {transform_indices = @transform_3, window_bounds = array<i64: 2, 16, 4>}, {transform_indices = @transform_4, window_bounds = array<i64: 2, 3, 16>}, {transform_indices = @transform_5, window_bounds = array<i64: 2, 1, 3, 3>}]} {
    %c0 = arith.constant 0 : index
    %c0_0 = arith.constant 0 : index
    %c0_1 = arith.constant 0 : index
    %0 = vector.load %arg2[%c0, %c0_0, %c0_1] : memref<2x16x32xf32, #tpu.memory_space<vmem>>, vector<2x16x32xf32>
    %c0_2 = arith.constant 0 : index
    %c0_3 = arith.constant 0 : index
    %c0_4 = arith.constant 0 : index
    %1 = vector.load %arg3[%c0_2, %c0_3, %c0_4] : memref<2x32x16xf32, #tpu.memory_space<vmem>>, vector<2x32x16xf32>
    %c0_5 = arith.constant 0 : index
    %c0_6 = arith.constant 0 : index
    %c0_7 = arith.constant 0 : index
    %2 = vector.load %arg4[%c0_5, %c0_6, %c0_7] : memref<2x3x16xf32, #tpu.memory_space<vmem>>, vector<2x3x16xf32>
    %c0_8 = arith.constant 0 : index
    %c0_9 = arith.constant 0 : index
    %c0_10 = arith.constant 0 : index
    %3 = vector.load %arg5[%c0_8, %c0_9, %c0_10] : memref<2x16x4xf32, #tpu.memory_space<vmem>>, vector<2x16x4xf32>
    %cst = arith.constant 0.176776692 : f32
    %4 = vector.broadcast %cst : f32 to vector<2x16x32xf32>
    %5 = arith.mulf %0, %4 : vector<2x16x32xf32>
    "tpu.trace_start"() <{level = 10 : i32, message = "bqd,bdn->bqn"}> : () -> ()
    %cst_11 = arith.constant dense<0.000000e+00> : vector<2x16x16xf32>
    %6 = tpu.matmul %5, %1, %cst_11 {dimension_numbers = #tpu.dot_dimension_numbers<[2], [1], [1], [2], [0, 0, 0, 1, 1, 2], [0], [0]>} : vector<2x16x32xf32>, vector<2x32x16xf32>, vector<2x16x16xf32> -> vector<2x16x16xf32>
    "tpu.trace_stop"() : () -> ()
    %cst_12 = arith.constant dense<0xFF800000> : vector<2x16xf32>
    %7 = vector.multi_reduction <maximumf>, %6, %cst_12 [2] : vector<2x16x16xf32> to vector<2x16xf32>
    %8 = vector.shape_cast %7 : vector<2x16xf32> to vector<2x16x1xf32>
    %9 = vector.broadcast %8 : vector<2x16x1xf32> to vector<2x16x16xf32>
    %10 = arith.subf %6, %9 : vector<2x16x16xf32>
    %11 = math.exp %10 : vector<2x16x16xf32>
    "tpu.trace_start"() <{level = 10 : i32, message = "bqn,bnc->bqc"}> : () -> ()
    %cst_13 = arith.constant dense<0.000000e+00> : vector<2x16x4xf32>
    %12 = tpu.matmul %11, %3, %cst_13 {dimension_numbers = #tpu.dot_dimension_numbers<[2], [1], [1], [2], [0, 0, 0, 1, 1, 2], [0], [0]>} : vector<2x16x16xf32>, vector<2x16x4xf32>, vector<2x16x4xf32> -> vector<2x16x4xf32>
    "tpu.trace_stop"() : () -> ()
    %13 = vector.extract_strided_slice %12 {offsets = [0, 0, 3], sizes = [2, 16, 1], strides = [1, 1, 1]} : vector<2x16x4xf32> to vector<2x16x1xf32>
    %14 = vector.extract_strided_slice %12 {offsets = [0, 0, 0], sizes = [2, 16, 3], strides = [1, 1, 1]} : vector<2x16x4xf32> to vector<2x16x3xf32>
    %15 = tpu.reciprocal %13 : vector<2x16x1xf32> -> vector<2x16x1xf32>
    %16 = vector.broadcast %15 : vector<2x16x1xf32> to vector<2x16x3xf32>
    %17 = arith.mulf %14, %16 : vector<2x16x3xf32>
    "tpu.trace_start"() <{level = 10 : i32, message = "bdq,bqe->bde"}> : () -> ()
    %cst_14 = arith.constant dense<0.000000e+00> : vector<2x3x3xf32>
    %18 = tpu.matmul %2, %17, %cst_14 {dimension_numbers = #tpu.dot_dimension_numbers<[2], [1], [1], [2], [0, 0, 0, 1, 1, 2], [0], [0]>} : vector<2x3x16xf32>, vector<2x16x3xf32>, vector<2x3x3xf32> -> vector<2x3x3xf32>
    "tpu.trace_stop"() : () -> ()
    %c0_15 = arith.constant 0 : index
    %c0_16 = arith.constant 0 : index
    %c0_17 = arith.constant 0 : index
    %c0_18 = arith.constant 0 : index
    %19 = vector.load %arg7[%c0_15, %c0_16, %c0_17, %c0_18] : memref<2x1x3x3xf32, #tpu.memory_space<vmem>>, vector<2x1x3x3xf32>
    %20 = vector.shape_cast %19 : vector<2x1x3x3xf32> to vector<2x3x3xf32>
    %21 = vector.shape_cast %18 : vector<2x3x3xf32> to vector<2x1x3x3xf32>
    tpu.vector_store %arg7[%c0_15, %c0_16, %c0_17, %c0_18], %21 {strides = array<i32>} : memref<2x1x3x3xf32, #tpu.memory_space<vmem>>, vector<2x1x3x3xf32>,
    %22 = vector.extract_strided_slice %17 {offsets = [0, 0, 0], sizes = [1, 16, 3], strides = [1, 1, 1]} : vector<2x16x3xf32> to vector<1x16x3xf32>
    %23 = vector.shape_cast %22 : vector<1x16x3xf32> to vector<16x3xf32>
    %24 = tpu.transpose %23, [1, 0] : vector<16x3xf32> -> vector<3x16xf32>
    %c0_19 = arith.constant 0 : index
    %c0_20 = arith.constant 0 : index
    %c0_21 = arith.constant 0 : index
    %25 = vector.load %arg6[%c0_19, %c0_20, %c0_21] : memref<2x3x16xf32, #tpu.memory_space<vmem>>, vector<1x3x16xf32>
    %26 = vector.shape_cast %25 : vector<1x3x16xf32> to vector<3x16xf32>
    %27 = vector.shape_cast %24 : vector<3x16xf32> to vector<1x3x16xf32>
    tpu.vector_store %arg6[%c0_19, %c0_20, %c0_21], %27 {strides = array<i32>} : memref<2x3x16xf32, #tpu.memory_space<vmem>>, vector<1x3x16xf32>,
    %28 = vector.extract_strided_slice %17 {offsets = [1, 0, 0], sizes = [1, 16, 3], strides = [1, 1, 1]} : vector<2x16x3xf32> to vector<1x16x3xf32>
    %29 = vector.shape_cast %28 : vector<1x16x3xf32> to vector<16x3xf32>
    %30 = tpu.transpose %29, [1, 0] : vector<16x3xf32> -> vector<3x16xf32>
    %c1 = arith.constant 1 : index
    %c0_22 = arith.constant 0 : index
    %c0_23 = arith.constant 0 : index
    %31 = vector.load %arg6[%c1, %c0_22, %c0_23] : memref<2x3x16xf32, #tpu.memory_space<vmem>>, vector<1x3x16xf32>
    %32 = vector.shape_cast %31 : vector<1x3x16xf32> to vector<3x16xf32>
    %33 = vector.shape_cast %30 : vector<3x16xf32> to vector<1x3x16xf32>
    tpu.vector_store %arg6[%c1, %c0_22, %c0_23], %33 {strides = array<i32>} : memref<2x3x16xf32, #tpu.memory_space<vmem>>, vector<1x3x16xf32>,
    return
  }
  func.func @transform_0(%arg0: i32, %arg1: i32) -> (i32, i32, i32) {
    %c0_i32 = arith.constant 0 : i32
    %c0_i32_0 = arith.constant 0 : i32
    return %arg0, %arg1, %c0_i32 : i32, i32, i32
  }
  func.func @transform_1(%arg0: i32, %arg1: i32) -> (i32, i32, i32) {
    %c0_i32 = arith.constant 0 : i32
    %c0_i32_0 = arith.constant 0 : i32
    %c0_i32_1 = arith.constant 0 : i32
    return %arg0, %c0_i32, %c0_i32_0 : i32, i32, i32
  }
  func.func @transform_2(%arg0: i32, %arg1: i32) -> (i32, i32, i32) {
    %c0_i32 = arith.constant 0 : i32
    %c0_i32_0 = arith.constant 0 : i32
    return %arg0, %c0_i32, %arg1 : i32, i32, i32
  }
  func.func @transform_3(%arg0: i32, %arg1: i32) -> (i32, i32, i32) {
    %c0_i32 = arith.constant 0 : i32
    %c0_i32_0 = arith.constant 0 : i32
    %c0_i32_1 = arith.constant 0 : i32
    return %arg0, %c0_i32, %c0_i32_0 : i32, i32, i32
  }
  func.func @transform_4(%arg0: i32, %arg1: i32) -> (i32, i32, i32) {
    %c0_i32 = arith.constant 0 : i32
    %c0_i32_0 = arith.constant 0 : i32
    return %arg0, %c0_i32, %arg1 : i32, i32, i32
  }
  func.func @transform_5(%arg0: i32, %arg1: i32) -> (i32, i32, i32, i32) {
    %c0_i32 = arith.constant 0 : i32
    %c0_i32_0 = arith.constant 0 : i32
    %c0_i32_1 = arith.constant 0 : i32
    return %arg0, %arg1, %c0_i32, %c0_i32_0 : i32, i32, i32, i32
  }
}

</mosaic_0001>

<bundles_post_ra>
// kernel: tpu_custom_call.1
= control target key start
LH: loop header
LB: loop body
LE: loop exit
PB: predicated region body
PF: predicated region fallthrough
CT: control target
= control target key end

     0   :  { %vm41_vm0 = vcmask 261120   ;;  %vm204_vm1 = vcmask 130048   ;;  %v783_v50 = vmov 3   ;;  %v784_v58 = vmov 0.0|0.0   ;;  %s897_s1 = inlined_call_operand.vmem [shape: f32[2,32,16], index: 1, kind: input, shape index: {}]   ;;  %s898_s0 = inlined_call_operand.vmem [shape: f32[2,16,32], index: 0, kind: input, shape index: {}]   ;;  %s899_s3 = inlined_call_operand.vmem [shape: f32[2,16,4], index: 3, kind: input, shape index: {}]   ;;  %s900_s2 = inlined_call_operand.vmem [shape: f32[2,3,16], index: 2, kind: input, shape index: {}]   ;;  %s901_s4 = inlined_call_operand.vmem [shape: f32[2,3,16], index: 4, kind: output, shape index: {0}]   ;;  %s902_s5 = inlined_call_operand.vmem [shape: f32[2,1,3,3], index: 5, kind: output, shape index: {1}]  }
   0x1   :  { %v23_v0 = vld [vmem:[%s897_s1] sm:$0xff]  ;;  %v24_v1 = vld [vmem:[%s897_s1 + $0x8] sm:$0xff]  ;;  %v25_v5 = vld [vmem:[%s897_s1 + $0x10] sm:$0xff]  ;;  %766 = vset.pattern.permute.xlu1 %v783_v50  ;;  %765 = vset.pattern.permute.xlu0 %v783_v50  ;;  %vm785_vm2 = vmmov 0   ;;  %v786_v60 = vmov 0.0   ;;  %vm600_vm3 = vcmask 124928  }
   0x2   :  { %v27_v2 = vld [vmem:[%s897_s1 + $0x20] sm:$0xff]  ;;  %v731_v3 = vpack.c.bf16 %v24_v1, %v23_v0  ;;  %v28_v4 = vld [vmem:[%s897_s1 + $0x28] sm:$0xff]  ;;  %v26_v6 = vld [vmem:[%s897_s1 + $0x18] sm:$0xff]  ;;  %vm565_vm4 = vcmask 18432  }
   0x3   :  { %v739_v7 = vpack.c.bf16 %v28_v4, %v27_v2  ;;  %v735_v8 = vpack.c.bf16 %v26_v6, %v25_v5  ;;  %v19_v9 = vld [vmem:[%s898_s0] sm:$0xff]  ;;  %v29_v10 = vld [vmem:[%s897_s1 + $0x30] sm:$0xff]  ;;  %v30_v11 = vld [vmem:[%s897_s1 + $0x38] sm:$0xff] }
   0x4   :  { %732 = vmatprep.subr.bf16.mxu0 %v731_v3  ;;  %v37_v12 = vmul.f32 0.17677669, %v19_v9  ;;  %v743_v13 = vpack.c.bf16 %v30_v11, %v29_v10  ;;  %v21_v14 = vld [vmem:[%s898_s0 + $0x10] sm:$0xff]  ;;  %v20_v15 = vld [vmem:[%s898_s0 + $0x8] sm:$0xff]  ;;  %v22_v17 = vld [vmem:[%s898_s0 + $0x18] sm:$0xff] }
   0x5   :  { %734 = vmatpush3.bf16.msra.mxu0 %v731_v3  ;;  %740 = vmatprep.subr.bf16.mxu1 %v739_v7  ;;  %v39_v16 = vmul.f32 0.17677669, %v21_v14  ;;  %v38_v18 = vmul.f32 0.17677669, %v20_v15  ;;  %v40_v19 = vmul.f32 0.17677669, %v22_v17 }
   0x6   :  { %736 = vmatprep.subr.bf16.mxu0 %v735_v8  ;;  %742 = vmatpush3.bf16.msra.mxu1 %v739_v7  ;;  %v33_v28 = vld [vmem:[%s899_s3] sm:$0xff]  ;;  %v34_v29 = vld [vmem:[%s899_s3 + $0x8] sm:$0xff]  ;;  %v35_v31 = vld [vmem:[%s899_s3 + $0x10] sm:$0xff] }
   0x7   :  { %689 = vmatprep.mubr.msk.f32.mxu0 %vm41_vm0, %v37_v12  ;;  %744 = vmatprep.subr.bf16.mxu1 %v743_v13  ;;  %v747_v30 = vpack.c.bf16 %v34_v29, %v33_v28  ;;  %v36_v32 = vld [vmem:[%s899_s3 + $0x18] sm:$0xff]  ;;  %v31_v4 = vld [vmem:[%s900_s2] sm:$0x7] }
   0x8   :  { %700 = vmatprep.mubr.msk.f32.mxu1 %vm41_vm0, %v39_v16  ;;  %v751_v33 = vpack.c.bf16 %v36_v32, %v35_v31 }
   0x9   :  { %738 = vmatpush3.bf16.msra.mxu0 %v735_v8  ;;  %v32_v8 = vld [vmem:[%s900_s2 + $0x4] sm:$0x7] }
   0xa   :  { %746 = vmatpush3.bf16.msra.mxu1 %v743_v13  ;;  %748 = vmatprep.subr.bf16.mxu0 %v747_v30 }
   0xb   :  { %752 = vmatprep.subr.bf16.mxu1 %v751_v33 }
   0xc   :  { %690 = vmatmul.mubr.msk.f32.vlgmr.msra.gmra.mrb[0].mxu0 %vm41_vm0, %v38_v18 }
   0xd   :  { %701 = vmatmul.mubr.msk.f32.vlgmr.msra.gmra.mrb[0].mxu1 %vm41_vm0, %v40_v19  ;;  %750 = vmatpush3.bf16.msra.mxu0 %v747_v30 }
   0xe   :  { %754 = vmatpush3.bf16.msra.mxu1 %v751_v33  ;;  %755 = vmatprep.subr.bf16.mxu0 %v784_v58 }
   0xf   :  { %758 = vmatprep.subr.bf16.mxu1 %v784_v58 }
  0xdf   :  { %v691_v20 = vpop.f32.mrb[0].mxu0 }
  0xe0   :  { %v114_v21 = vpop.f32.mrb[1].mxu0  ;;  %v208_v22 = vsel %vm204_vm1, %v691_v20, -inf  ;;  %v702_v23 = vpop.f32.mrb[0].mxu1 }
  0xe1   :  { %209 = vmax.xlane.f32.xlu1 %v208_v22  ;;  %v205_v24 = vsel %vm204_vm1, %v114_v21, -inf  ;;  %v195_v25 = vpop.f32.mrb[1].mxu1  ;;  %v214_v26 = vsel %vm204_vm1, %v702_v23, -inf }
  0xe2   :  { %206 = vmax.xlane.f32.xlu0 %v205_v24  ;;  %v211_v27 = vsel %vm204_vm1, %v195_v25, -inf }
  0xe5   :  { %215 = vmax.xlane.f32.xlu1 %v214_v26 }
  0xe6   :  { %212 = vmax.xlane.f32.xlu0 %v211_v27 }
 0x16e   :  { %v210_v34 = vpop.xlane.xlu1 %209 }
 0x16f   :  { %v218_v35 = vsub.f32 %v691_v20, %v210_v34  ;;  %v207_v36 = vpop.xlane.xlu0 %206 }
 0x170   :  { %v217_v37 = vsub.f32 %v114_v21, %v207_v36 }
 0x171   :  { %v223_v38 = vmul.f32 1.442695, %v218_v35 }
 0x172   :  { %v221_v39 = vmul.f32 1.442695, %v217_v37  ;;  %v216_v40 = vpop.xlane.xlu1 %215 }
 0x173   :  { %v220_v41 = vsub.f32 %v702_v23, %v216_v40  ;;  %v213_v42 = vpop.xlane.xlu0 %212 }
 0x174   :  { %767 = vpow2.f32 %v221_v39  ;;  %v219_v43 = vsub.f32 %v195_v25, %v213_v42 }
 0x175   :  { %769 = vpow2.f32 %v223_v38  ;;  %v227_v44 = vmul.f32 1.442695, %v220_v41 }
 0x176   :  { %v225_v45 = vmul.f32 1.442695, %v219_v43 }
 0x178   :  { %771 = vpow2.f32 %v225_v45 }
 0x179   :  { %773 = vpow2.f32 %v227_v44 }
 0x17e   :  { %v768_v46 = vpop.eup %767 }
 0x17f   :  { %v770_v47 = vpop.eup %769  ;;  %707 = vmatprep.mubr.msk.f32.mxu0 %vm204_vm1, %v768_v46 }
 0x180   :  { %708 = vmatmul.mubr.msk.f32.vlgmr.msra.gmra.mrb[2].mxu0 %vm204_vm1, %v770_v47 }
 0x181   :  { %721 = vmatprep.mubr.msk.f32.mxu0 %vm785_vm2, %v786_v60 }
 0x182   :  { %v772_v48 = vpop.eup %771 }
 0x183   :  { %v774_v49 = vpop.eup %773  ;;  %714 = vmatprep.mubr.msk.f32.mxu1 %vm204_vm1, %v772_v48 }
 0x184   :  { %715 = vmatmul.mubr.msk.f32.vlgmr.msra.gmra.mrb[2].mxu1 %vm204_vm1, %v774_v49 }
 0x185   :  { %728 = vmatprep.mubr.msk.f32.mxu1 %vm785_vm2, %v786_v60 }
 0x253   :  { %v709_v51 = vpop.f32.mrb[2].mxu0 }
 0x254   :  { %775 = vrcp.f32 %v709_v51  ;;  %v301_v52 = vpop.f32.mrb[3].mxu0 }
 0x255   :  { %777 = vrcp.f32 %v301_v52 }
 0x257   :  { %v716_v53 = vpop.f32.mrb[2].mxu1 }
 0x258   :  { %v382_v54 = vpop.f32.mrb[3].mxu1 }
 0x259   :  { %779 = vrcp.f32 %v382_v54 }
 0x25a   :  { %781 = vrcp.f32 %v716_v53 }
 0x25e   :  { %v776_v55 = vpop.eup %775 }
 0x25f   :  { %v778_v56 = vpop.eup %777  ;;  %402 = vperm.xlu1 %766, %v776_v55  }
 0x260   :  { %397 = vperm.xlu0 %765, %v778_v56  }
 0x263   :  { %v780_v57 = vpop.eup %779 }
 0x264   :  { %407 = vperm.xlu1 %766, %v780_v57   ;;  %v782_v59 = vpop.eup %781 }
 0x268   :  { %412 = vperm.xlu1 %766, %v782_v59  }
 0x2de   :  { %v403_v61 = vpop.permute.xlu1 %402 }
 0x2df   :  { %v416_v62 = vmul.f32 %v709_v51, %v403_v61  ;;  %v398_v63 = vpop.permute.xlu0 %397 }
 0x2e0   :  { %v415_v0 = vmul.f32 %v398_v63, %v301_v52 }
 0x2e2   :  { %v756_v1 = vpack.c.bf16 %v416_v62, %v415_v0  ;;  %568 = vxpose.xlu1.b32.start [1/2] (short) (narrow) %v415_v0, 8 }
 0x2e3   :  { %v408_v2 = vpop.permute.xlu1 %407 }
 0x2e4   :  { %v417_v3 = vmul.f32 %v408_v2, %v382_v54  ;;  %757 = vmatpush3.bf16.msra.mxu0 %v756_v1 }
 0x2e6   :  { %602 = vxpose.xlu0.b32.start [1/2] (short) (narrow) %v417_v3, 8  ;;  %569 = vxpose.xlu1.b32.end [2/2] (short) (narrow) %v416_v62, 8 }
 0x2e7   :  { %v413_v5 = vpop.permute.xlu1 %412  ;;  %722 = vmatmul.mubr.msk.f32.vlgmr.msra.gmra.mrb[4].mxu0 %vm204_vm1, %v31_v4 }
 0x2e8   :  { %v418_v6 = vmul.f32 %v716_v53, %v413_v5 }
 0x2ea   :  { %v759_v7 = vpack.c.bf16 %v418_v6, %v417_v3  ;;  %603 = vxpose.xlu0.b32.end [2/2] (short) (narrow) %v418_v6, 8 }
 0x2ec   :  { %760 = vmatpush3.bf16.msra.mxu1 %v759_v7 }
 0x2ef   :  { %729 = vmatmul.mubr.msk.f32.vlgmr.msra.gmra.mrb[4].mxu1 %vm204_vm1, %v32_v8 }
 0x362   :  { %v584_v9 = vpop.trf.xlu1 }
 0x363   :  { %601 = vst.msk [vmem:[%s901_s4] sm:$0x7] %vm600_vm3, %v584_v9 }
 0x366   :  { %v618_v10 = vpop.trf.xlu0 }
 0x367   :  { %654 = vst.msk [vmem:[%s901_s4 + $0x4] sm:$0x7] %vm600_vm3, %v618_v10 }
 0x3ba   :  { %v488_v11 = vpop.f32.mrb[4].mxu0 }
 0x3bb   :  { %566 = vst.msk [vmem:[%s902_s5] sm:$0x7] %vm565_vm4, %v488_v11  ;;  %v723_v12 = vpop.f32.mrb[5].mxu0 }
 0x3c2   :  { %v561_v13 = vpop.f32.mrb[4].mxu1 }
 0x3c3   :  { %567 = vst.msk [vmem:[%s902_s5 + $0x4] sm:$0x7] %vm565_vm4, %v561_v13  ;;  %v730_v14 = vpop.f32.mrb[5].mxu1 }

</bundles_post_ra>
